<compile_context>
chip_gen: v7x
topology: tpu7x:2x2x1
jax: 0.10.0
libtpu: 0.0.40
codegen_flags: <defaults>
</compile_context>

<pallas_src>
import math
from functools import partial

import numpy as np
import jax
import jax.numpy as jnp
from jax import lax
from jax.experimental import pallas as pl
from jax.experimental.pallas import tpu as pltpu


# ----------------------------------------------------------------------------
# helpers
# ----------------------------------------------------------------------------
def _round_up(x, m):
    return ((x + m - 1) // m) * m


def _padded_bytes(shape, elem_bytes=4):
    """Bytes for one buffer with last two dims padded to the (8,128) vreg tile."""
    shape = tuple(shape)
    if len(shape) == 1:
        shape = (1,) + shape
    lead = 1
    for d in shape[:-2]:
        lead *= int(d)
    sub = _round_up(int(shape[-2]), 8)
    lane = _round_up(int(shape[-1]), 128)
    return lead * sub * lane * elem_bytes


def _vmem_budget(entries, slack=2 << 20, lo=8 << 20, hi=48 << 20):
    """entries: list of (shape, elem_bytes, buffer_count)."""
    total = slack
    for shape, ebytes, count in entries:
        total += _padded_bytes(shape, ebytes) * count
    return int(min(max(total, lo), hi))


_HIGH = lax.Precision.HIGHEST


# ----------------------------------------------------------------------------
# Kernel 1: per-type Sc_Attention with fused neighbor gather
#   grid = (n_pad // TILE_N,)  axis is "parallel"
# ----------------------------------------------------------------------------
def _sc_attention_kernel(idx_ref, pro_ref, bank_ref, a_self_ref, a_neib_ref,
                         out_ref):
    # idx_ref:    [TILE_N, S]  int32 sampled neighbor ids (into bank)
    # pro_ref:    [TILE_N, H]
    # bank_ref:   [M, H]       per-type neighbor feature bank (VMEM resident)
    # a_self_ref: [1, H]       first half of the 2H attention vector
    # a_neib_ref: [1, H]       second half
    # out_ref:    [TILE_N, H]
    tile_n, h = pro_ref.shape
    m_rows = bank_ref.shape[0]
    n_samples = idx_ref.shape[1]

    pro = pro_ref[...]
    bank = bank_ref[...]
    a_self = a_self_ref[...]
    a_neib = a_neib_ref[...]
    idx = idx_ref[...]

    # <pro, a_self> — shared by every neighbor of a row
    score_self = jnp.sum(pro * a_self, axis=-1, keepdims=True)        # [TILE_N,1]

    # hoisted out of the S loop (JAX does not CSE broadcasts inside loops)
    col_iota = lax.broadcasted_iota(jnp.int32, (tile_n, m_rows), 1)

    neibs, marks = [], []
    for s in range(n_samples):                     # S is small & static: unrolled
        col = idx[:, s:s + 1]                                          # [TILE_N,1]
        # exact gather-as-matmul: one-hot(idx) @ bank  (MXU)
        onehot = (col == col_iota).astype(jnp.float32)                 # [TILE_N,M]
        neib = jnp.dot(onehot, bank, precision=_HIGH,
                       preferred_element_type=jnp.float32)             # [TILE_N,H]
        mark = score_self + jnp.sum(neib * a_neib, axis=-1, keepdims=True)
        # leaky_relu (PyTorch default negative_slope = 0.01)
        mark = jnp.where(mark > 0, mark, 0.01 * mark)
        neibs.append(neib)
        marks.append(mark)

    # streaming softmax over the S neighbors (max-subtracted)
    m = marks[0]
    for s in range(1, n_samples):
        m = jnp.maximum(m, marks[s])
    num = jnp.zeros((tile_n, h), jnp.float32)
    den = jnp.zeros((tile_n, 1), jnp.float32)
    for s in range(n_samples):
        e = jnp.exp(marks[s] - m)
        den = den + e
        num = num + e * neibs[s]

    out_ref[...] = num / den


def sc_attention(pro_padded, bank, idx_padded, attn, *, tile_n):
    # pro_padded: [n_pad, H], bank: [M, H], idx_padded: [n_pad, S], attn: [2H,1]
    n_pad, h = pro_padded.shape
    m_rows = bank.shape[0]
    n_samples = idx_padded.shape[1]
    grid = (n_pad // tile_n,)

    a_self = attn[:h, 0].reshape(1, h)
    a_neib = attn[h:, 0].reshape(1, h)

    vmem_limit = _vmem_budget([
        ((tile_n, n_samples), 4, 2),          # idx  (double-buffered)
        ((tile_n, h), 4, 2),                  # pro
        ((m_rows, h), 4, 2),                  # bank
        ((1, h), 4, 4),                       # a_self / a_neib
        ((tile_n, h), 4, 2),                  # out
        ((tile_n, m_rows), 4, 2),             # one-hot intermediate
        ((tile_n, h), 4, n_samples + 2),      # live neighbor tiles + accumulators
    ])

    return pl.pallas_call(
        _sc_attention_kernel,
        out_shape=jax.ShapeDtypeStruct((n_pad, h), jnp.float32),
        grid_spec=pltpu.PrefetchScalarGridSpec(
            num_scalar_prefetch=0,
            grid=grid,
            in_specs=[
                pl.BlockSpec((tile_n, n_samples), lambda i: (i, 0)),
                pl.BlockSpec((tile_n, h), lambda i: (i, 0)),
                pl.BlockSpec((m_rows, h), lambda i: (0, 0)),   # resident
                pl.BlockSpec((1, h), lambda i: (0, 0)),
                pl.BlockSpec((1, h), lambda i: (0, 0)),
            ],
            out_specs=pl.BlockSpec((tile_n, h), lambda i: (i, 0)),
        ),
        compiler_params=pltpu.CompilerParams(
            dimension_semantics=("parallel",),
            vmem_limit_bytes=vmem_limit,
        ),
    )(idx_padded, pro_padded, bank, a_self, a_neib)


# ----------------------------------------------------------------------------
# Kernel 2 (stage 1): global type-score reduction over N  -> softmax weights
#   grid = (n_pad // TILE_N,)  axis is "arbitrary" (accumulation)
# ----------------------------------------------------------------------------
def _beta_score_kernel(feats_ref, w_ref, b_ref, beta_ref, w_out_ref, acc_ref,
                       *, n_valid):
    # feats_ref: [T, TILE_N, H]   stacked per-type features (padded over N)
    # w_ref:     [H, H]           sc_linear weight PRE-TRANSPOSED (in x out)
    # b_ref:     [1, H]
    # beta_ref:  [H, 1]
    # w_out_ref: [T, 1]           softmax weights (written at last step)
    # acc_ref:   [T, H]  VMEM scratch, persists across grid steps
    i = pl.program_id(0)
    n_steps = pl.num_programs(0)
    t, tile_n, h = feats_ref.shape

    @pl.when(i == 0)
    def _init():
        acc_ref[...] = jnp.zeros_like(acc_ref)
        w_out_ref[...] = jnp.zeros_like(w_out_ref)

    feats = feats_ref[...]                                   # [T, TILE_N, H]
    # fuse the T per-type Linear passes into ONE matmul
    flat = feats.reshape(t * tile_n, h)
    hidden = jnp.tanh(
        jnp.dot(flat, w_ref[...], precision=_HIGH,
                preferred_element_type=jnp.float32) + b_ref[...])
    hidden = hidden.reshape(t, tile_n, h)

    # mask padded rows so the global mean over the real N stays exact
    row = i * tile_n + lax.broadcasted_iota(jnp.int32, (tile_n, 1), 0)
    mask = (row < n_valid).astype(jnp.float32)               # [TILE_N, 1]
    acc_ref[...] += jnp.sum(hidden * mask[None, :, :], axis=1)   # [T, H]

    @pl.when(i == n_steps - 1)
    def _finalize():
        mean = acc_ref[...] * (1.0 / n_valid)                # [T, H]
        scores = jnp.dot(mean, beta_ref[...], precision=_HIGH,
                         preferred_element_type=jnp.float32)  # [T, 1]
        scores = scores - jnp.max(scores, axis=0, keepdims=True)
        e = jnp.exp(scores)
        w_out_ref[...] = e / jnp.sum(e, axis=0, keepdims=True)


def sc_beta_weights(feats, sc_w_t, sc_b, beta_attn, n_valid, *, tile_n):
    t, n_pad, h = feats.shape
    grid = (n_pad // tile_n,)

    vmem_limit = _vmem_budget([
        ((t, tile_n, h), 4, 2),               # feats tile
        ((h, h), 4, 2), ((1, h), 4, 2), ((h, 1), 4, 2),
        ((t, 1), 4, 2),                       # weights out
        ((t, h), 4, 1),                       # scratch accumulator
        ((t * tile_n, h), 4, 3),              # intermediates
    ])

    return pl.pallas_call(
        partial(_beta_score_kernel, n_valid=n_valid),
        out_shape=jax.ShapeDtypeStruct((t, 1), jnp.float32),
        grid_spec=pltpu.PrefetchScalarGridSpec(
            num_scalar_prefetch=0,
            grid=grid,
            in_specs=[
                pl.BlockSpec((t, tile_n, h), lambda i: (0, i, 0)),
                pl.BlockSpec((h, h), lambda i: (0, 0)),
                pl.BlockSpec((1, h), lambda i: (0, 0)),
                pl.BlockSpec((h, 1), lambda i: (0, 0)),
            ],
            out_specs=pl.BlockSpec((t, 1), lambda i: (0, 0)),
            scratch_shapes=[pltpu.VMEM((t, h), jnp.float32)],
        ),
        compiler_params=pltpu.CompilerParams(
            dimension_semantics=("arbitrary",),      # cross-tile accumulation
            vmem_limit_bytes=vmem_limit,
        ),
    )(feats, sc_w_t, sc_b, beta_attn)


# ----------------------------------------------------------------------------
# Kernel 3 (stage 2): weighted combine of the T per-type features
#   grid = (n_pad // TILE_N,)  axis is "parallel"
# ----------------------------------------------------------------------------
def _beta_combine_kernel(feats_ref, w_ref, z_ref):
    # feats_ref: [T, TILE_N, H],  w_ref: [T, 1],  z_ref: [TILE_N, H]
    feats = feats_ref[...]
    w = w_ref[...]                                           # [T, 1]
    z_ref[...] = jnp.sum(feats * w[:, :, None], axis=0)


def sc_beta_combine(feats, weights, *, tile_n):
    t, n_pad, h = feats.shape
    grid = (n_pad // tile_n,)

    vmem_limit = _vmem_budget([
        ((t, tile_n, h), 4, 3),
        ((t, 1), 4, 2),
        ((tile_n, h), 4, 2),
    ])

    return pl.pallas_call(
        _beta_combine_kernel,
        out_shape=jax.ShapeDtypeStruct((n_pad, h), jnp.float32),
        grid_spec=pltpu.PrefetchScalarGridSpec(
            num_scalar_prefetch=0,
            grid=grid,
            in_specs=[
                pl.BlockSpec((t, tile_n, h), lambda i: (0, i, 0)),
                pl.BlockSpec((t, 1), lambda i: (0, 0)),
            ],
            out_specs=pl.BlockSpec((tile_n, h), lambda i: (i, 0)),
        ),
        compiler_params=pltpu.CompilerParams(
            dimension_semantics=("parallel",),
            vmem_limit_bytes=vmem_limit,
        ),
    )(feats, weights)


# ----------------------------------------------------------------------------
# Host-side neighbor sampling (the reference also uses np.random.choice)
# ----------------------------------------------------------------------------
def sample_neighbors(other_neibor_list, sample_list, np_rng):
    idx_list = []
    for i, s_num in enumerate(sample_list):
        rows = []
        for now_neibor in other_neibor_list[i]:
            now_neibor = np.asarray(now_neibor)
            if len(now_neibor) > s_num:
                rows.append(np_rng.choice(now_neibor, s_num, replace=False))
            else:
                rows.append(np_rng.choice(now_neibor, s_num, replace=True))
        idx_list.append(np.stack(rows, axis=0).astype(np.int32))   # [N, S_i]
    return idx_list


# ----------------------------------------------------------------------------
# Full Sc_encoder forward (device-side, given sampled neighbor indices)
# ----------------------------------------------------------------------------
def sc_encoder_forward(params, pro_feature, other_features_list, idx_list,
                       *, tile_n=512):
    # TODO(synk): nn.Dropout(attn_drop) on the attention vectors is identity
    # here (eval mode / p=0).
    n, h = pro_feature.shape
    tile = min(tile_n, _round_up(n, 8))
    n_pad = _round_up(n, tile)
    pad = n_pad - n

    pro_p = jnp.pad(pro_feature, ((0, pad), (0, 0))) if pad else pro_feature

    per_type = []
    for i, idx in enumerate(idx_list):
        s_num = idx.shape[1]
        if pad:
            idx = np.concatenate([idx, np.zeros((pad, s_num), np.int32)], axis=0)
        idx_dev = jnp.asarray(idx, dtype=jnp.int32)                 # [n_pad, S_i]
        item = sc_attention(pro_p, other_features_list[i], idx_dev,
                            params["attn"][i], tile_n=tile)         # [n_pad, H]
        per_type.append(item)

    feats = jnp.stack(per_type, axis=0)                             # [T, n_pad, H]
    sc_w_t = params["sc_w"].T                                       # pre-transposed
    sc_b = params["sc_b"].reshape(1, h)

    weights = sc_beta_weights(feats, sc_w_t, sc_b, params["beta_attn"], n,
                              tile_n=tile)                          # [T, 1]
    z = sc_beta_combine(feats, weights, tile_n=tile)                # [n_pad, H]
    return z[:n]


# ----------------------------------------------------------------------------
# Pure-JAX reference (for a correctness check in __main__)
# ----------------------------------------------------------------------------
def sc_encoder_reference(params, pro_feature, other_features_list, idx_list):
    n, h = pro_feature.shape
    items = []
    for i, idx in enumerate(idx_list):
        neib = jnp.take(other_features_list[i], jnp.asarray(idx), axis=0)  # [N,S,H]
        attn = params["attn"][i]
        a_self, a_neib = attn[:h, 0], attn[h:, 0]
        mark = (pro_feature @ a_self)[:, None, None] + (neib @ a_neib)[:, :, None]
        mark = jnp.where(mark > 0, mark, 0.01 * mark)
        p = jax.nn.softmax(mark, axis=1)
        items.append(jnp.sum(neib * p, axis=1))
    scores = []
    for it in items:
        m = jnp.tanh(it @ params["sc_w"].T + params["sc_b"]).mean(0)
        scores.append(m @ params["beta_attn"][:, 0])
    w = jax.nn.softmax(jnp.stack(scores))
    z = 0.0
    for i in range(len(items)):
        z = z + w[i] * items[i]
    return z


# ----------------------------------------------------------------------------
if __name__ == "__main__":
    H = 32            # hidden
    N = 10            # number of "pro" nodes (non-multiple of 8 to exercise padding)
    T = 2             # number of neighbor types
    sample_list = [4, 6]
    other_sizes = [12, 10]

    key = jax.random.PRNGKey(0)
    keys = jax.random.split(key, 8)

    pro_feature = jax.random.normal(keys[0], (N, H), jnp.float32)
    other_features_list = [
        jax.random.normal(keys[1], (other_sizes[0], H), jnp.float32),
        jax.random.normal(keys[2], (other_sizes[1], H), jnp.float32),
    ]

    # synthetic variable-length neighbor-id lists per node per type
    np_rng = np.random.default_rng(0)
    other_neibor_list = []
    for t in range(T):
        per_node = []
        for _ in range(N):
            deg = int(np_rng.integers(2, 9))
            per_node.append(np_rng.integers(0, other_sizes[t], size=deg))
        other_neibor_list.append(per_node)

    # deterministic parameter init (xavier_uniform, gain=1.414 as in the module)
    def xavier(k, shape, gain=1.414):
        fan_out, fan_in = shape
        bound = gain * math.sqrt(6.0 / (fan_in + fan_out))
        return jax.random.uniform(k, shape, jnp.float32, -bound, bound)

    params = {
        "attn": [xavier(keys[3], (2 * H, 1)), xavier(keys[4], (2 * H, 1))],
        "sc_w": xavier(keys[5], (H, H)),
        "sc_b": jax.random.uniform(keys[6], (H,), jnp.float32,
                                   -1.0 / math.sqrt(H), 1.0 / math.sqrt(H)),
        "beta_attn": xavier(keys[7], (H, 1)),
    }

    # sample once so the Pallas path and the reference see identical indices
    idx_list = sample_neighbors(other_neibor_list, sample_list, np_rng)

    # small tile to exercise the multi-tile grid, accumulation and row masking
    z = sc_encoder_forward(params, pro_feature, other_features_list, idx_list,
                           tile_n=8)
    z = jax.block_until_ready(z)

    assert z.shape == (N, H) and z.dtype == jnp.float32
    assert bool(jnp.all(jnp.isfinite(z)))

    z_ref = sc_encoder_reference(params, pro_feature, other_features_list,
                                 idx_list)
    max_err = float(jnp.max(jnp.abs(z - z_ref)))
    assert max_err < 5e-2, f"mismatch vs reference: max_err={max_err}"

    print("KERNEL_OK")
</pallas_src>

<mosaic_0001>
module attributes {stable_mosaic.version = 11 : i64} {
  func.func @_sc_attention_kernel(%arg0: i32, %arg1: memref<8x4xi32, #tpu.memory_space<vmem>>, %arg2: memref<8x32xf32, #tpu.memory_space<vmem>>, %arg3: memref<12x32xf32, #tpu.memory_space<vmem>>, %arg4: memref<1x32xf32, #tpu.memory_space<vmem>>, %arg5: memref<1x32xf32, #tpu.memory_space<vmem>>, %arg6: memref<8x32xf32, #tpu.memory_space<vmem>>) attributes {dimension_semantics = [#tpu.dimension_semantics<parallel>], iteration_bounds = array<i64: 2>, scalar_prefetch = 0 : i64, scratch_operands = 0 : i64, tpu.core_type = #tpu.core_type<tc>, window_params = [{transform_indices = @transform_0, window_bounds = array<i64: 8, 4>}, {transform_indices = @transform_1, window_bounds = array<i64: 8, 32>}, {pipeline_mode = #tpu.pipeline_mode<synchronous>, transform_indices = @transform_2, window_bounds = array<i64: 12, 32>}, {pipeline_mode = #tpu.pipeline_mode<synchronous>, transform_indices = @transform_3, window_bounds = array<i64: 1, 32>}, {pipeline_mode = #tpu.pipeline_mode<synchronous>, transform_indices = @transform_4, window_bounds = array<i64: 1, 32>}, {transform_indices = @transform_5, window_bounds = array<i64: 8, 32>}]} {
    %c0 = arith.constant 0 : index
    %c0_0 = arith.constant 0 : index
    %0 = vector.load %arg2[%c0, %c0_0] : memref<8x32xf32, #tpu.memory_space<vmem>>, vector<8x32xf32>
    %c0_1 = arith.constant 0 : index
    %c0_2 = arith.constant 0 : index
    %1 = vector.load %arg3[%c0_1, %c0_2] : memref<12x32xf32, #tpu.memory_space<vmem>>, vector<12x32xf32>
    %c0_3 = arith.constant 0 : index
    %c0_4 = arith.constant 0 : index
    %2 = vector.load %arg4[%c0_3, %c0_4] : memref<1x32xf32, #tpu.memory_space<vmem>>, vector<1x32xf32>
    %c0_5 = arith.constant 0 : index
    %c0_6 = arith.constant 0 : index
    %3 = vector.load %arg5[%c0_5, %c0_6] : memref<1x32xf32, #tpu.memory_space<vmem>>, vector<1x32xf32>
    %c0_7 = arith.constant 0 : index
    %c0_8 = arith.constant 0 : index
    %4 = vector.load %arg1[%c0_7, %c0_8] : memref<8x4xi32, #tpu.memory_space<vmem>>, vector<8x4xi32>
    %5 = vector.broadcast %2 : vector<1x32xf32> to vector<8x32xf32>
    %6 = arith.mulf %0, %5 : vector<8x32xf32>
    %cst = arith.constant dense<0.000000e+00> : vector<8xf32>
    %7 = vector.multi_reduction <add>, %6, %cst [1] : vector<8x32xf32> to vector<8xf32>
    %8 = vector.shape_cast %7 : vector<8xf32> to vector<8x1xf32>
    %9 = tpu.iota {dimensions = array<i32: 1>} : vector<8x12xi32>
    %10 = vector.extract_strided_slice %4 {offsets = [0, 0], sizes = [8, 1], strides = [1, 1]} : vector<8x4xi32> to vector<8x1xi32>
    %11 = vector.broadcast %10 : vector<8x1xi32> to vector<8x12xi32>
    %12 = arith.cmpi eq, %11, %9 : vector<8x12xi32>
    %13 = arith.extui %12 : vector<8x12xi1> to vector<8x12xi32>
    %14 = arith.sitofp %13 : vector<8x12xi32> to vector<8x12xf32>
    %cst_9 = arith.constant dense<0.000000e+00> : vector<8x32xf32>
    %15 = tpu.matmul %14, %1, %cst_9 {dimension_numbers = #tpu.dot_dimension_numbers<[1], [0], [0], [1], [0, 0, 1, 1], [], []>, precision = #tpu.contract_precision<fp32>} : vector<8x12xf32>, vector<12x32xf32>, vector<8x32xf32> -> vector<8x32xf32>
    %16 = vector.broadcast %3 : vector<1x32xf32> to vector<8x32xf32>
    %17 = arith.mulf %15, %16 : vector<8x32xf32>
    %cst_10 = arith.constant dense<0.000000e+00> : vector<8xf32>
    %18 = vector.multi_reduction <add>, %17, %cst_10 [1] : vector<8x32xf32> to vector<8xf32>
    %19 = vector.shape_cast %18 : vector<8xf32> to vector<8x1xf32>
    %20 = arith.addf %8, %19 : vector<8x1xf32>
    %cst_11 = arith.constant 0.000000e+00 : f32
    %21 = vector.broadcast %cst_11 : f32 to vector<8x1xf32>
    %22 = arith.cmpf ogt, %20, %21 : vector<8x1xf32>
    %cst_12 = arith.constant 0.00999999977 : f32
    %23 = vector.broadcast %cst_12 : f32 to vector<8x1xf32>
    %24 = arith.mulf %23, %20 : vector<8x1xf32>
    %25 = arith.select %22, %20, %24 : vector<8x1xi1>, vector<8x1xf32>
    %26 = vector.extract_strided_slice %4 {offsets = [0, 1], sizes = [8, 1], strides = [1, 1]} : vector<8x4xi32> to vector<8x1xi32>
    %27 = vector.broadcast %26 : vector<8x1xi32> to vector<8x12xi32>
    %28 = arith.cmpi eq, %27, %9 : vector<8x12xi32>
    %29 = arith.extui %28 : vector<8x12xi1> to vector<8x12xi32>
    %30 = arith.sitofp %29 : vector<8x12xi32> to vector<8x12xf32>
    %cst_13 = arith.constant dense<0.000000e+00> : vector<8x32xf32>
    %31 = tpu.matmul %30, %1, %cst_13 {dimension_numbers = #tpu.dot_dimension_numbers<[1], [0], [0], [1], [0, 0, 1, 1], [], []>, precision = #tpu.contract_precision<fp32>} : vector<8x12xf32>, vector<12x32xf32>, vector<8x32xf32> -> vector<8x32xf32>
    %32 = vector.broadcast %3 : vector<1x32xf32> to vector<8x32xf32>
    %33 = arith.mulf %31, %32 : vector<8x32xf32>
    %cst_14 = arith.constant dense<0.000000e+00> : vector<8xf32>
    %34 = vector.multi_reduction <add>, %33, %cst_14 [1] : vector<8x32xf32> to vector<8xf32>
    %35 = vector.shape_cast %34 : vector<8xf32> to vector<8x1xf32>
    %36 = arith.addf %8, %35 : vector<8x1xf32>
    %cst_15 = arith.constant 0.000000e+00 : f32
    %37 = vector.broadcast %cst_15 : f32 to vector<8x1xf32>
    %38 = arith.cmpf ogt, %36, %37 : vector<8x1xf32>
    %cst_16 = arith.constant 0.00999999977 : f32
    %39 = vector.broadcast %cst_16 : f32 to vector<8x1xf32>
    %40 = arith.mulf %39, %36 : vector<8x1xf32>
    %41 = arith.select %38, %36, %40 : vector<8x1xi1>, vector<8x1xf32>
    %42 = vector.extract_strided_slice %4 {offsets = [0, 2], sizes = [8, 1], strides = [1, 1]} : vector<8x4xi32> to vector<8x1xi32>
    %43 = vector.broadcast %42 : vector<8x1xi32> to vector<8x12xi32>
    %44 = arith.cmpi eq, %43, %9 : vector<8x12xi32>
    %45 = arith.extui %44 : vector<8x12xi1> to vector<8x12xi32>
    %46 = arith.sitofp %45 : vector<8x12xi32> to vector<8x12xf32>
    %cst_17 = arith.constant dense<0.000000e+00> : vector<8x32xf32>
    %47 = tpu.matmul %46, %1, %cst_17 {dimension_numbers = #tpu.dot_dimension_numbers<[1], [0], [0], [1], [0, 0, 1, 1], [], []>, precision = #tpu.contract_precision<fp32>} : vector<8x12xf32>, vector<12x32xf32>, vector<8x32xf32> -> vector<8x32xf32>
    %48 = vector.broadcast %3 : vector<1x32xf32> to vector<8x32xf32>
    %49 = arith.mulf %47, %48 : vector<8x32xf32>
    %cst_18 = arith.constant dense<0.000000e+00> : vector<8xf32>
    %50 = vector.multi_reduction <add>, %49, %cst_18 [1] : vector<8x32xf32> to vector<8xf32>
    %51 = vector.shape_cast %50 : vector<8xf32> to vector<8x1xf32>
    %52 = arith.addf %8, %51 : vector<8x1xf32>
    %cst_19 = arith.constant 0.000000e+00 : f32
    %53 = vector.broadcast %cst_19 : f32 to vector<8x1xf32>
    %54 = arith.cmpf ogt, %52, %53 : vector<8x1xf32>
    %cst_20 = arith.constant 0.00999999977 : f32
    %55 = vector.broadcast %cst_20 : f32 to vector<8x1xf32>
    %56 = arith.mulf %55, %52 : vector<8x1xf32>
    %57 = arith.select %54, %52, %56 : vector<8x1xi1>, vector<8x1xf32>
    %58 = vector.extract_strided_slice %4 {offsets = [0, 3], sizes = [8, 1], strides = [1, 1]} : vector<8x4xi32> to vector<8x1xi32>
    %59 = vector.broadcast %58 : vector<8x1xi32> to vector<8x12xi32>
    %60 = arith.cmpi eq, %59, %9 : vector<8x12xi32>
    %61 = arith.extui %60 : vector<8x12xi1> to vector<8x12xi32>
    %62 = arith.sitofp %61 : vector<8x12xi32> to vector<8x12xf32>
    %cst_21 = arith.constant dense<0.000000e+00> : vector<8x32xf32>
    %63 = tpu.matmul %62, %1, %cst_21 {dimension_numbers = #tpu.dot_dimension_numbers<[1], [0], [0], [1], [0, 0, 1, 1], [], []>, precision = #tpu.contract_precision<fp32>} : vector<8x12xf32>, vector<12x32xf32>, vector<8x32xf32> -> vector<8x32xf32>
    %64 = vector.broadcast %3 : vector<1x32xf32> to vector<8x32xf32>
    %65 = arith.mulf %63, %64 : vector<8x32xf32>
    %cst_22 = arith.constant dense<0.000000e+00> : vector<8xf32>
    %66 = vector.multi_reduction <add>, %65, %cst_22 [1] : vector<8x32xf32> to vector<8xf32>
    %67 = vector.shape_cast %66 : vector<8xf32> to vector<8x1xf32>
    %68 = arith.addf %8, %67 : vector<8x1xf32>
    %cst_23 = arith.constant 0.000000e+00 : f32
    %69 = vector.broadcast %cst_23 : f32 to vector<8x1xf32>
    %70 = arith.cmpf ogt, %68, %69 : vector<8x1xf32>
    %cst_24 = arith.constant 0.00999999977 : f32
    %71 = vector.broadcast %cst_24 : f32 to vector<8x1xf32>
    %72 = arith.mulf %71, %68 : vector<8x1xf32>
    %73 = arith.select %70, %68, %72 : vector<8x1xi1>, vector<8x1xf32>
    %74 = arith.maximumf %25, %41 : vector<8x1xf32>
    %75 = arith.maximumf %74, %57 : vector<8x1xf32>
    %76 = arith.maximumf %75, %73 : vector<8x1xf32>
    %cst_25 = arith.constant 0.000000e+00 : f32
    %77 = vector.broadcast %cst_25 : f32 to vector<8x32xf32>
    %cst_26 = arith.constant 0.000000e+00 : f32
    %78 = vector.broadcast %cst_26 : f32 to vector<8x1xf32>
    %79 = arith.subf %25, %76 : vector<8x1xf32>
    %80 = math.exp %79 : vector<8x1xf32>
    %81 = arith.addf %78, %80 : vector<8x1xf32>
    %82 = vector.broadcast %80 : vector<8x1xf32> to vector<8x32xf32>
    %83 = arith.mulf %82, %15 : vector<8x32xf32>
    %84 = arith.addf %77, %83 : vector<8x32xf32>
    %85 = arith.subf %41, %76 : vector<8x1xf32>
    %86 = math.exp %85 : vector<8x1xf32>
    %87 = arith.addf %81, %86 : vector<8x1xf32>
    %88 = vector.broadcast %86 : vector<8x1xf32> to vector<8x32xf32>
    %89 = arith.mulf %88, %31 : vector<8x32xf32>
    %90 = arith.addf %84, %89 : vector<8x32xf32>
    %91 = arith.subf %57, %76 : vector<8x1xf32>
    %92 = math.exp %91 : vector<8x1xf32>
    %93 = arith.addf %87, %92 : vector<8x1xf32>
    %94 = vector.broadcast %92 : vector<8x1xf32> to vector<8x32xf32>
    %95 = arith.mulf %94, %47 : vector<8x32xf32>
    %96 = arith.addf %90, %95 : vector<8x32xf32>
    %97 = arith.subf %73, %76 : vector<8x1xf32>
    %98 = math.exp %97 : vector<8x1xf32>
    %99 = arith.addf %93, %98 : vector<8x1xf32>
    %100 = vector.broadcast %98 : vector<8x1xf32> to vector<8x32xf32>
    %101 = arith.mulf %100, %63 : vector<8x32xf32>
    %102 = arith.addf %96, %101 : vector<8x32xf32>
    %103 = vector.broadcast %99 : vector<8x1xf32> to vector<8x32xf32>
    %104 = arith.divf %102, %103 : vector<8x32xf32>
    %c0_27 = arith.constant 0 : index
    %c0_28 = arith.constant 0 : index
    %105 = vector.load %arg6[%c0_27, %c0_28] : memref<8x32xf32, #tpu.memory_space<vmem>>, vector<8x32xf32>
    tpu.vector_store %arg6[%c0_27, %c0_28], %104 {strides = array<i32>} : memref<8x32xf32, #tpu.memory_space<vmem>>, vector<8x32xf32>,
    return
  }
  func.func @transform_0(%arg0: i32) -> (i32, i32) {
    %c0_i32 = arith.constant 0 : i32
    %c0_i32_0 = arith.constant 0 : i32
    return %arg0, %c0_i32 : i32, i32
  }
  func.func @transform_1(%arg0: i32) -> (i32, i32) {
    %c0_i32 = arith.constant 0 : i32
    %c0_i32_0 = arith.constant 0 : i32
    return %arg0, %c0_i32 : i32, i32
  }
  func.func @transform_2(%arg0: i32) -> (i32, i32) {
    %c0_i32 = arith.constant 0 : i32
    %c0_i32_0 = arith.constant 0 : i32
    %c0_i32_1 = arith.constant 0 : i32
    return %c0_i32, %c0_i32_0 : i32, i32
  }
  func.func @transform_3(%arg0: i32) -> (i32, i32) {
    %c0_i32 = arith.constant 0 : i32
    %c0_i32_0 = arith.constant 0 : i32
    %c0_i32_1 = arith.constant 0 : i32
    return %c0_i32, %c0_i32_0 : i32, i32
  }
  func.func @transform_4(%arg0: i32) -> (i32, i32) {
    %c0_i32 = arith.constant 0 : i32
    %c0_i32_0 = arith.constant 0 : i32
    %c0_i32_1 = arith.constant 0 : i32
    return %c0_i32, %c0_i32_0 : i32, i32
  }
  func.func @transform_5(%arg0: i32) -> (i32, i32) {
    %c0_i32 = arith.constant 0 : i32
    %c0_i32_0 = arith.constant 0 : i32
    return %arg0, %c0_i32 : i32, i32
  }
}

</mosaic_0001>

<bundles_post_ra>
// kernel: tpu_custom_call.1
= control target key start
LH: loop header
LB: loop body
LE: loop exit
PB: predicated region body
PF: predicated region fallthrough
CT: control target
= control target key end

     0   :  { %10 = vsyncpa [#allocation3], 0  ;;  %s3212_s0 = inlined_call_operand.vmem [shape: s32[16,4], index: 0, kind: input, shape index: {}]   ;;  %s3213_s1 = inlined_call_operand.vmem [shape: f32[16,32], index: 1, kind: input, shape index: {}]   ;;  %s3214_s2 = inlined_call_operand.hbm [shape: f32[12,32], index: 2, kind: input, shape index: {}]   ;;  %s3215_s3 = inlined_call_operand.vmem [shape: f32[1,32], index: 3, kind: input, shape index: {}]   ;;  %s3216_s4 = inlined_call_operand.vmem [shape: f32[1,32], index: 4, kind: input, shape index: {}]   ;;  %s3217_s5 = inlined_call_operand.hbm [shape: f32[16,32], index: 5, kind: output, shape index: {}]  }
   0x1   :  { %11 = vsyncpa [#allocation4], 0 }
   0x2   :  { %13 = vsyncpa [#allocation4 + $0x1], 0  ;;  %s2907_s18 = smov 0   ;;  %s2909_s19 = smov 0  }
   0x3   :  { %s2911_s20 = smov 0   ;;  %s2913_s21 = smov 0  }
   0x4 LB: > { %s2928_s22 = sadd.s32 4294967295, %s2864_s21   ;;  %s2313_s23 = sadd.s32 4294967294, %s2864_s21   ;;  %s2864_s21 = sphi %s2913_s21, %s3233_s21   ;;  %s2860_s20 = sphi %s2911_s20, %s3232_s20   ;;  %s2856_s19 = sphi %s2909_s19, %s3231_s19   ;;  %s2852_s18 = sphi %s2907_s18, %s3230_s18  }
   0x5   : > { %s2932_s24 = sadd.s32 1, %s2864_s21   ;;  %s141_s25 = sadd.s32 1, %s2860_s20 }
   0x6   : > { %s138_s26 = ssub.s32 %s2864_s21, %s2932_s24  ;;  %p151_p0 = scmp.ne.s32.totalorder %s2860_s20, %s2856_s19 }
   0x7   : > { %p139_p1 = scmp.eq.s32.totalorder %s138_s26, 0  ;;  %p152_p2 = scmp.eq.s32.totalorder %s2928_s22, 1 }
   0x8   : > { %p157_p3 = scmp.ne.s32.totalorder %s2856_s19, %s2852_s18  ;;  %p158_p4 = scmp.eq.s32.totalorder %s2313_s23, 1 }
   0x9   : > { %s2943_s27 = scalar_select %p139_p1, %s2860_s20, %s141_s25  }
   0xa   : > { %p2945_p5 = por %p152_p2, %p151_p0  ;;  %p2949_p6 = por %p158_p4, %p157_p3 }
   0xb   : > { %p2314_p7 = scmp.ge.s32.totalorder %s2864_s21, 1  ;;  %p165_p8 = scmp.lt.s32.totalorder %s2864_s21, 3 }
   0xc   : > { %s3221_s28 = scalar_select %p2945_p5, 1, 0 }
   0xd   : > { %s3222_s29 = scalar_select %p2949_p6, 1, 0 }
   0xe   : > { %p3218_p9 = scmp.eq.s32.totalorder %s2928_s22, 0  ;;  %p2956_p10 = pnand %p2314_p7, %p165_p8 }
   0xf   : > { %s2866_s6 = smov [#allocation2]   ;;  %s2770_s11 = scalar_lea.hbm %s3214_s2, 256 }
  0x10   : > { %s3223_s30 = scalar_select %p2956_p10, 1, 0 }
  0x11   : > { %s177_s7 = sshll.u32 %s2866_s6, 4  ;;  %p2702_p11 = pneg %p2956_p10  ;;  %s178_s7 = int_to_ptr.vmem [resolvable:$true] %s177_s7 }
  0x12   : > { %p2771_p13 = scmp.ne.s32.totalorder %s3214_s2, %s2770_s11  ;;  %p2777_p3 = scmp.lt.u32.totalorder %s2770_s11, %s3214_s2 }
  0x13   : > { %p2964_p12 = pnand %p3218_p9, %p2702_p11 }
  0x15   : > { %p2772_p0 = pneg %p2964_p12 }
  0x17   : > { %p2773_p1 = pnand %p2772_p0, %p2771_p13 }
  0x19   : > { %p2774_p2 = pneg %p2773_p1 }
  0x1b   : > { %p2779_p4 = pnand %p2777_p3, %p2774_p2 }
  0x1d   : > { %2782 = shalt.err (!%p2779_p4)
}
  0x1e   : > { %s2783_s16 = scalar_lea.vmem %s178_s7, 256  ;;  %p2791_p9 = scmp.lt.s32.totalorder %s178_s7, %s178_s7 }
  0x1f   : > { %p2784_p7 = scmp.ne.s32.totalorder %s178_s7, %s2783_s16  ;;  %p2792_p6 = scmp.lt.s32.totalorder %s2783_s16, %s2783_s16 }
  0x21   : > { %p2786_p8 = pnand %p2784_p7, %p2772_p0  ;;  %p2793_p5 = por %p2792_p6, %p2791_p9 }
  0x23   : > { %p2787_p11 = pneg %p2786_p8 }
  0x25   : > { %p2794_p10 = pnand %p2793_p5, %p2787_p11 }
  0x27   : > { %2797 = shalt.err (!%p2794_p10)
}
  0x28   : > { %s2867_s17 = smov 128   ;;  %s2868_s23 = smov 8  }
  0x29   : > { %2705 = dma.hbm_to_vmem [thread:$0]  (!%p2964_p12), %s3214_s2, 256, %s178_s7, [#allocation3], %s2867_s17, %s2867_s17, %s2868_s23  }
  0x2a   : > { %p3225_p13 = scmp.ne.s32.totalorder %s3223_s30, 0 }
  0x2b   : > { %p3226_p1 = scmp.eq.s32.totalorder (!%p3225_p13), %s2928_s22, 0 }
  0x2c   : > { %213 = sbr.rel (%p3225_p13) target bundleno = 700 (0x2bc), region = 40 }
  0x33   : > { %2843 = dma.done.wait (%p3226_p1), [#allocation3], 256   ;;  %p3227_p0 = pmov %p3226_p1 }
  0x34   : > { %p244_p5 = scmp.lt.s32.totalorder %s2928_s22, 1  ;;  %v2869_v0 = vmov 0   ;;  %v2870_v1 = vmov 2   ;;  %v254_v3 = vld [vmem:[#allocation2 + $0x8] sm:$0xf]  ;;  %vm281_vm0 = vcmask 1043456   ;;  %v269_v24 = vlaneseq }
  0x35   : > { %2845 = vsyncadd (%p3227_p0), [#allocation3], 4294967040  ;;  %2755 = vset.pattern.permute.xlu0 %v2869_v0  ;;  %2757 = vset.pattern.permute.xlu1 %v2870_v1  ;;  %v253_v4 = vld [vmem:[#allocation2] sm:$0xff]  ;;  %v283_v5 = vsel %vm281_vm0, %v254_v3, 0  ;;  %v2871_v6 = vmov 1   ;;  %v2872_v7 = vmov 3  }
  0x36   : > { %s2992_s6 = scalar_select %p244_p5, %s2928_s22, 1  ;;  %v286_v8 = vand.u32 4294901760, %v253_v4  ;;  %v289_v9 = vand.u32 4294901760, %v283_v5  ;;  %v2873_v13 = vmov 0.0|0.0   ;;  %vm2874_vm1 = vmmov 0  }
  0x37   : > { %2584 = vmatprep.subr.bf16.mxu0 %v2873_v13  ;;  %2602 = vmatprep.subr.bf16.mxu1 %v2873_v13  ;;  %v2875_v16 = vmov 0.0   ;;  %v270_v25 = vand.u32 127, %v269_v24  ;;  %vm277_vm2 = vcmask 97280   ;;  %v2322_v55 = vld [vmem:[%s3215_s3] ss:$0 sm:$0xff]  ;;  %vm265_vm7 = vcmask 261120  }
  0x38   : > { %s2320_s7 = sshll.u32 %s2992_s6, 3  ;;  %v3000_v10 = vpack.c.bf16 %v289_v9, %v286_v8  ;;  %v364_v11 = vsub.f32 %v253_v4, %v286_v8  ;;  %v371_v12 = vsub.f32 %v283_v5, %v289_v9  ;;  %2420 = vmatprep.mubr.msk.f32.mxu0 %vm2874_vm1, %v2875_v16  ;;  %2462 = vmatprep.mubr.msk.f32.mxu1 %vm2874_vm1, %v2875_v16  ;;  %v2327_v58 = vld [vmem:[%s3216_s4] ss:$0 sm:$0xff]  ;;  %s241_s17 = sand.u32 1, %s2856_s19  }
  0x39   : > { %s247_s9 = scalar_lea.vmem %s3212_s0, %s2320_s7  ;;  %s251_s12 = scalar_lea.vmem %s3213_s1, %s2320_s7 }
  0x3a   : > { %v257_v2 = vld [vmem:[%s247_s9] sm:$0xff]  ;;  %2586 = vmatpush3.bf16.msra.mxu0 %v3000_v10  ;;  %2604 = vmatpush3.bf16.msra.mxu1 %v3000_v10  ;;  %v365_v14 = vand.u32 4294901760, %v364_v11  ;;  %v372_v15 = vand.u32 4294901760, %v371_v12  ;;  %v3014_v22 = vpack.c.bf16 %v371_v12, %v364_v11  ;;  %s2319_s23 = sshll.u32 %s241_s17, 3  ;;  %s2341_s25 = sshll.u32 %s2928_s22, 7 }
  0x3b   : > { %272 = vperm.xlu0 %2755, %v257_v2   ;;  %1235 = vperm.xlu1 %2757, %v257_v2   ;;  %v252_v54 = vld [vmem:[%s251_s12] sm:$0xff]  ;;  %s243_s26 = scalar_lea.vmem [#allocation5], %s2319_s23  ;;  %s3169_s8 = scalar_lea.hbm %s3217_s5, %s2341_s25 }
  0x3c   : > { %2587 = vmatprep.subr.bf16.mxu0 %v2873_v13  ;;  %v366_v17 = vsub.f32 %v364_v11, %v365_v14  ;;  %v373_v18 = vsub.f32 %v371_v12, %v372_v15  ;;  %2605 = vmatprep.subr.bf16.mxu1 %v2873_v13  ;;  %v3016_v23 = vpack.c.bf16 %v372_v15, %v365_v14  ;;  %s2230_s6 = sshll.u32 %s243_s26, 4  ;;  %s2217_s9 = scalar_lea.sflag [#allocation4], %s241_s17  ;;  %s3171_s6 = int_to_ptr.vmem [resolvable:$true] %s2230_s6 }
  0x3d   : > { %v264_v56 = vmul.f32 %v2322_v55, %v252_v54  ;;  %s2798_s10 = scalar_lea.vmem %s3171_s6, 128  ;;  %p3228_p9 = scmp.ne.s32.totalorder %s3221_s28, 0 }
  0x3e   : > { %v367_v19 = vand.u32 4294901760, %v366_v17  ;;  %v374_v20 = vand.u32 4294901760, %v373_v18  ;;  %p2799_p6 = scmp.ne.s32.totalorder %s3171_s6, %s2798_s10  ;;  %s2876_s22 = smov [#allocation5]  }
  0x3f   : > { %2756 = vset.pattern.permute.xlu0 %v2871_v6  ;;  %2758 = vset.pattern.permute.xlu1 %v2872_v7  ;;  %v266_v57 = vsel %vm265_vm7, %v264_v56, 0.0  ;;  %s2802_s11 = sshll.u32 %s2876_s22, 4  ;;  %s2803_s11 = int_to_ptr.vmem [resolvable:$false] %s2802_s11 }
  0x40   : > { %759 = vperm.xlu0 %2756, %v257_v2   ;;  %1711 = vperm.xlu1 %2758, %v257_v2   ;;  %v3012_v21 = vpack.c.bf16 %v374_v20, %v367_v19  ;;  %p2800_p10 = pnand %p2799_p6, %p3228_p9  ;;  %s2804_s12 = scalar_lea.vmem %s2803_s11, 256 }
  0x41   : > { %p2805_p2 = scmp.lt.s32.totalorder %s3171_s6, %s2803_s11  ;;  %p2806_p3 = scmp.lt.s32.totalorder %s2804_s12, %s2798_s10 }
  0x42   : > { %p2801_p12 = pneg %p2800_p10 }
  0x43   : > { %p2807_p4 = por %p2806_p3, %p2805_p2 }
  0x44   : > { %2759 = vset.pattern.permute.xlu0 %v2872_v7 }
  0x45   : > { %p2808_p7 = pnand %p2807_p4, %p2801_p12 }
  0x64   : > { %267 = vadd.xlane.f32.xlu1 %v266_v57 }
  0xba   : > { %v273_v26 = vpop.permute.xlu0 %272  ;;  %v1236_v40 = vpop.permute.xlu1 %1235 }
  0xbb   : > { %vm274_vm3 = vcmp.eq.s32.totalorder %v273_v26, %v270_v25  ;;  %vm1237_vm5 = vcmp.eq.s32.totalorder %v1236_v40, %v270_v25 }
  0xbc   : > { %v3019_v27 = vsel %vm274_vm3, 1.0, %v2875_v16  ;;  %v3057_v42 = vsel %vm1237_vm5, 1.0, %v2875_v16 }
  0xbd   : > { %v279_v28 = vsel %vm277_vm2, %v3019_v27, 0  ;;  %v1241_v43 = vsel %vm277_vm2, %v3057_v42, 0 }
  0xbe   : > { %v353_v29 = vsub.f32 %v279_v28, %v279_v28  ;;  %v1311_v45 = vsub.f32 %v1241_v43, %v1241_v43 }
  0xbf   : > { %v760_v30 = vpop.permute.xlu0 %759  ;;  %v1712_v41 = vpop.permute.xlu1 %1711 }
  0xc0   : > { %vm761_vm4 = vcmp.eq.s32.totalorder %v760_v30, %v270_v25  ;;  %v354_v31 = vand.u32 4294901760, %v353_v29  ;;  %vm1713_vm6 = vcmp.eq.s32.totalorder %v1712_v41, %v270_v25  ;;  %v1312_v47 = vand.u32 4294901760, %v1311_v45 }
  0xc1   : > { %v3024_v32 = vsel %vm761_vm4, 1.0, %v2875_v16  ;;  %v3066_v44 = vsel %vm1713_vm6, 1.0, %v2875_v16 }
  0xc2   : > { %v765_v33 = vsel %vm277_vm2, %v3024_v32, 0  ;;  %v355_v34 = vsub.f32 %v353_v29, %v354_v31  ;;  %v1717_v46 = vsel %vm277_vm2, %v3066_v44, 0  ;;  %v1313_v49 = vsub.f32 %v1311_v45, %v1312_v47 }
  0xc3   : > { %v835_v35 = vsub.f32 %v765_v33, %v765_v33  ;;  %v1787_v48 = vsub.f32 %v1717_v46, %v1717_v46 }
  0xc4   : > { %v356_v36 = vand.u32 4294901760, %v355_v34  ;;  %v1314_v51 = vand.u32 4294901760, %v1313_v49 }
  0xc5   : > { %v836_v37 = vand.u32 4294901760, %v835_v35  ;;  %v1788_v50 = vand.u32 4294901760, %v1787_v48 }
  0xc6   : > { %2421 = vmatmul.mubr.f32.vlgmr.msra.gmra.mrb[0].mxu0 %v356_v36 }
  0xc7   : > { %2589 = vmatpush3.bf16.msra.mxu0 %v3012_v21  ;;  %v837_v38 = vsub.f32 %v835_v35, %v836_v37  ;;  %2427 = vmatprep.mubr.msk.f32.mxu0 %vm2874_vm1, %v2875_v16  ;;  %v1789_v52 = vsub.f32 %v1787_v48, %v1788_v50 }
  0xc8   : > { %2590 = vmatprep.subr.bf16.mxu0 %v2873_v13 }
  0xc9   : > { %v838_v39 = vand.u32 4294901760, %v837_v38  ;;  %v1790_v53 = vand.u32 4294901760, %v1789_v52 }
  0xcb   : > { %2463 = vmatmul.mubr.f32.vlgmr.msra.gmra.mrb[0].mxu1 %v838_v39 }
  0xcc   : > { %2607 = vmatpush3.bf16.msra.mxu1 %v3012_v21  ;;  %2469 = vmatprep.mubr.msk.f32.mxu1 %vm2874_vm1, %v2875_v16 }
  0xcd   : > { %2608 = vmatprep.subr.bf16.mxu1 %v2873_v13 }
  0xce   : > { %2428 = vmatmul.mubr.msk.f32.vlgmr.msra.gmra.mrb[0].mxu0 %vm277_vm2, %v3019_v27 }
  0xcf   : > { %2592 = vmatpush3.bf16.msra.mxu0 %v3014_v22  ;;  %2434 = vmatprep.mubr.msk.f32.mxu0 %vm2874_vm1, %v2875_v16 }
  0xd0   : > { %2593 = vmatprep.subr.bf16.mxu0 %v2873_v13 }
  0xd3   : > { %2470 = vmatmul.mubr.msk.f32.vlgmr.msra.gmra.mrb[0].mxu1 %vm277_vm2, %v3024_v32 }
  0xd4   : > { %2610 = vmatpush3.bf16.msra.mxu1 %v3014_v22  ;;  %2476 = vmatprep.mubr.msk.f32.mxu1 %vm2874_vm1, %v2875_v16 }
  0xd5   : > { %2611 = vmatprep.subr.bf16.mxu1 %v2873_v13 }
  0xd6   : > { %2435 = vmatmul.mubr.f32.vlgmr.msra.gmra.mrb[0].mxu0 %v353_v29 }
  0xd7   : > { %2595 = vmatpush3.bf16.msra.mxu0 %v3000_v10  ;;  %2441 = vmatprep.mubr.msk.f32.mxu0 %vm2874_vm1, %v2875_v16 }
  0xd8   : > { %2596 = vmatprep.subr.bf16.mxu0 %v2873_v13 }
  0xdb   : > { %2477 = vmatmul.mubr.f32.vlgmr.msra.gmra.mrb[0].mxu1 %v835_v35 }
  0xdc   : > { %2613 = vmatpush3.bf16.msra.mxu1 %v3000_v10  ;;  %2483 = vmatprep.mubr.msk.f32.mxu1 %vm2874_vm1, %v2875_v16 }
  0xdd   : > { %2614 = vmatprep.subr.bf16.mxu1 %v2873_v13 }
  0xde   : > { %2442 = vmatmul.mubr.f32.vlgmr.msra.gmra.mrb[0].mxu0 %v354_v31 }
  0xdf   : > { %2598 = vmatpush3.bf16.msra.mxu0 %v3016_v23  ;;  %2448 = vmatprep.mubr.msk.f32.mxu0 %vm2874_vm1, %v2875_v16 }
  0xe0   : > { %2599 = vmatprep.subr.bf16.mxu0 %v2873_v13 }
  0xe3   : > { %2484 = vmatmul.mubr.f32.vlgmr.msra.gmra.mrb[0].mxu1 %v836_v37 }
  0xe4   : > { %2616 = vmatpush3.bf16.msra.mxu1 %v3016_v23  ;;  %2490 = vmatprep.mubr.msk.f32.mxu1 %vm2874_vm1, %v2875_v16 }
  0xe5   : > { %2617 = vmatprep.subr.bf16.mxu1 %v2873_v13 }
  0xe6   : > { %2449 = vmatmul.mubr.msk.f32.vlgmr.msra.gmra.mrb[0].mxu0 %vm277_vm2, %v3019_v27 }
  0xe7   : > { %2601 = vmatpush3.bf16.msra.mxu0 %v3000_v10  ;;  %2455 = vmatprep.mubr.msk.f32.mxu0 %vm2874_vm1, %v2875_v16 }
  0xe8   : > { %2620 = vmatprep.subr.bf16.mxu0 %v2873_v13 }
  0xeb   : > { %2491 = vmatmul.mubr.msk.f32.vlgmr.msra.gmra.mrb[0].mxu1 %vm277_vm2, %v3024_v32 }
  0xec   : > { %2619 = vmatpush3.bf16.msra.mxu1 %v3000_v10  ;;  %2497 = vmatprep.mubr.msk.f32.mxu1 %vm2874_vm1, %v2875_v16 }
  0xed   : > { %2638 = vmatprep.subr.bf16.mxu1 %v2873_v13 }
  0xee   : > { %2456 = vmatmul.mubr.msk.f32.vlgmr.msra.gmra.mrb[0].mxu0 %vm277_vm2, %v3019_v27 }
  0xef   : > { %2622 = vmatpush3.bf16.msra.mxu0 %v3000_v10  ;;  %2504 = vmatprep.mubr.msk.f32.mxu0 %vm2874_vm1, %v2875_v16 }
  0xf0   : > { %2623 = vmatprep.subr.bf16.mxu0 %v2873_v13 }
  0xf2   : > { %2505 = vmatmul.mubr.f32.vlgmr.msra.gmra.mrb[2].mxu0 %v1314_v51 }
  0xf3   : > { %2498 = vmatmul.mubr.msk.f32.vlgmr.msra.gmra.mrb[0].mxu1 %vm277_vm2, %v3024_v32  ;;  %2625 = vmatpush3.bf16.msra.mxu0 %v3012_v21 }
  0xf4   : > { %2640 = vmatpush3.bf16.msra.mxu1 %v3000_v10  ;;  %2546 = vmatprep.mubr.msk.f32.mxu1 %vm2874_vm1, %v2875_v16 }
  0xf5   : > { %2641 = vmatprep.subr.bf16.mxu1 %v2873_v13  ;;  %2511 = vmatprep.mubr.msk.f32.mxu0 %vm2874_vm1, %v2875_v16 }
  0xf6   : > { %2626 = vmatprep.subr.bf16.mxu0 %v2873_v13 }
  0xf7   : > { %2547 = vmatmul.mubr.f32.vlgmr.msra.gmra.mrb[2].mxu1 %v1790_v53 }
  0xf8   : > { %2643 = vmatpush3.bf16.msra.mxu1 %v3012_v21  ;;  %2553 = vmatprep.mubr.msk.f32.mxu1 %vm2874_vm1, %v2875_v16 }
  0xf9   : > { %2644 = vmatprep.subr.bf16.mxu1 %v2873_v13 }
  0xfa   : > { %2512 = vmatmul.mubr.msk.f32.vlgmr.msra.gmra.mrb[2].mxu0 %vm277_vm2, %v3057_v42 }
  0xfb   : > { %2628 = vmatpush3.bf16.msra.mxu0 %v3014_v22  ;;  %2518 = vmatprep.mubr.msk.f32.mxu0 %vm2874_vm1, %v2875_v16 }
  0xfc   : > { %2629 = vmatprep.subr.bf16.mxu0 %v2873_v13 }
  0xff   : > { %2554 = vmatmul.mubr.msk.f32.vlgmr.msra.gmra.mrb[2].mxu1 %vm277_vm2, %v3066_v44 }
 0x100   : > { %2646 = vmatpush3.bf16.msra.mxu1 %v3014_v22  ;;  %2560 = vmatprep.mubr.msk.f32.mxu1 %vm2874_vm1, %v2875_v16 }
 0x101   : > { %2647 = vmatprep.subr.bf16.mxu1 %v2873_v13 }
 0x102   : > { %2519 = vmatmul.mubr.f32.vlgmr.msra.gmra.mrb[2].mxu0 %v1311_v45 }
 0x103   : > { %2631 = vmatpush3.bf16.msra.mxu0 %v3000_v10  ;;  %2525 = vmatprep.mubr.msk.f32.mxu0 %vm2874_vm1, %v2875_v16 }
 0x104   : > { %2632 = vmatprep.subr.bf16.mxu0 %v2873_v13 }
 0x107   : > { %2561 = vmatmul.mubr.f32.vlgmr.msra.gmra.mrb[2].mxu1 %v1787_v48 }
 0x108   : > { %2649 = vmatpush3.bf16.msra.mxu1 %v3000_v10  ;;  %2567 = vmatprep.mubr.msk.f32.mxu1 %vm2874_vm1, %v2875_v16 }
 0x109   : > { %2650 = vmatprep.subr.bf16.mxu1 %v2873_v13 }
 0x10a   : > { %2526 = vmatmul.mubr.f32.vlgmr.msra.gmra.mrb[2].mxu0 %v1312_v47 }
 0x10b   : > { %2634 = vmatpush3.bf16.msra.mxu0 %v3016_v23  ;;  %2532 = vmatprep.mubr.msk.f32.mxu0 %vm2874_vm1, %v2875_v16 }
 0x10c   : > { %2635 = vmatprep.subr.bf16.mxu0 %v2873_v13 }
 0x10f   : > { %2568 = vmatmul.mubr.f32.vlgmr.msra.gmra.mrb[2].mxu1 %v1788_v50 }
 0x110   : > { %2652 = vmatpush3.bf16.msra.mxu1 %v3016_v23  ;;  %2574 = vmatprep.mubr.msk.f32.mxu1 %vm2874_vm1, %v2875_v16 }
 0x111   : > { %2653 = vmatprep.subr.bf16.mxu1 %v2873_v13  ;;  %v268_v13 = vpop.xlane.xlu1 %267 }
 0x112   : > { %2533 = vmatmul.mubr.msk.f32.vlgmr.msra.gmra.mrb[2].mxu0 %vm277_vm2, %v3057_v42 }
 0x113   : > { %2637 = vmatpush3.bf16.msra.mxu0 %v3000_v10  ;;  %2539 = vmatprep.mubr.msk.f32.mxu0 %vm2874_vm1, %v2875_v16 }
 0x117   : > { %2575 = vmatmul.mubr.msk.f32.vlgmr.msra.gmra.mrb[2].mxu1 %vm277_vm2, %v3066_v44 }
 0x118   : > { %2655 = vmatpush3.bf16.msra.mxu1 %v3000_v10  ;;  %2581 = vmatprep.mubr.msk.f32.mxu1 %vm2874_vm1, %v2875_v16 }
 0x11a   : > { %2540 = vmatmul.mubr.msk.f32.vlgmr.msra.gmra.mrb[2].mxu0 %vm277_vm2, %v3057_v42 }
 0x11f   : > { %2582 = vmatmul.mubr.msk.f32.vlgmr.msra.gmra.mrb[2].mxu1 %vm277_vm2, %v3066_v44 }
 0x1c1   : > { %v740_v59 = vpop.f32.mrb[0].mxu0 }
 0x1c2   : > { %v750_v60 = vmul.f32 %v2327_v58, %v740_v59  ;;  %v2457_v61 = vpop.f32.mrb[1].mxu0 }
 0x1c4   : > { %v751_v62 = vsel %vm265_vm7, %v750_v60, 0.0 }
 0x1c5   : > { %752 = vadd.xlane.f32.xlu0 %v751_v62 }
 0x1c6   : > { %v1222_v63 = vpop.f32.mrb[0].mxu1 }
 0x1c7   : > { %v1226_v0 = vmul.f32 %v2327_v58, %v1222_v63  ;;  %v2499_v1 = vpop.f32.mrb[1].mxu1 }
 0x1c9   : > { %v1227_v2 = vsel %vm265_vm7, %v1226_v0, 0.0 }
 0x1ca   : > { %1228 = vadd.xlane.f32.xlu0 %v1227_v2 }
 0x1ed   : > { %v1698_v3 = vpop.f32.mrb[2].mxu0 }
 0x1ee   : > { %v1702_v4 = vmul.f32 %v2327_v58, %v1698_v3  ;;  %v2541_v5 = vpop.f32.mrb[3].mxu0 }
 0x1f0   : > { %v1703_v6 = vsel %vm265_vm7, %v1702_v4, 0.0 }
 0x1f1   : > { %1704 = vadd.xlane.f32.xlu1 %v1703_v6 }
 0x1f2   : > { %v2174_v7 = vpop.f32.mrb[2].mxu1 }
 0x1f3   : > { %v2178_v8 = vmul.f32 %v2327_v58, %v2174_v7  ;;  %v2583_v9 = vpop.f32.mrb[3].mxu1 }
 0x1f5   : > { %v2179_v10 = vsel %vm265_vm7, %v2178_v8, 0.0 }
 0x1f6   : > { %2180 = vadd.xlane.f32.xlu0 %v2179_v10 }
 0x252   : > { %v753_v11 = vpop.xlane.xlu0 %752 }
 0x253   : > { %v754_v15 = vadd.f32 %v753_v11, %v268_v13 }
 0x255   : > { %v756_v19 = vmul.f32 0.01, %v754_v15  ;;  %vm755_vm9 = vcmp.gt.f32.partialorder %v754_v15, 0.0 }
 0x257   : > { %v1229_v12 = vpop.xlane.xlu0 %1228  ;;  %v757_v23 = vsel %vm755_vm9, %v754_v15, %v756_v19 }
 0x258   : > { %v1230_v14 = vadd.f32 %v1229_v12, %v268_v13 }
 0x25a   : > { %v1232_v16 = vmul.f32 0.01, %v1230_v14  ;;  %vm1231_vm8 = vcmp.gt.f32.partialorder %v1230_v14, 0.0 }
 0x25c   : > { %v1233_v21 = vsel %vm1231_vm8, %v1230_v14, %v1232_v16 }
 0x25d   : > { %v2186_v26 = vmax.f32 %v757_v23, %v1233_v21 }
 0x27e   : > { %v1705_v17 = vpop.xlane.xlu1 %1704 }
 0x27f   : > { %v1706_v18 = vadd.f32 %v1705_v17, %v268_v13 }
 0x281   : > { %vm1707_vm10 = vcmp.gt.f32.partialorder %v1706_v18, 0.0  ;;  %v1708_v20 = vmul.f32 0.01, %v1706_v18 }
 0x283   : > { %v2181_v22 = vpop.xlane.xlu0 %2180  ;;  %v1709_v24 = vsel %vm1707_vm10, %v1706_v18, %v1708_v20 }
 0x284   : > { %v2182_v25 = vadd.f32 %v2181_v22, %v268_v13  ;;  %v2187_v28 = vmax.f32 %v2186_v26, %v1709_v24 }
 0x286   : > { %vm2183_vm11 = vcmp.gt.f32.partialorder %v2182_v25, 0.0  ;;  %v2184_v27 = vmul.f32 0.01, %v2182_v25 }
 0x288   : > { %v2185_v29 = vsel %vm2183_vm11, %v2182_v25, %v2184_v27 }
 0x289   : > { %v2188_v30 = vmax.f32 %v2187_v28, %v2185_v29 }
 0x28b   : > { %v2189_v31 = vsub.f32 %v757_v23, %v2188_v30  ;;  %v2195_v32 = vsub.f32 %v1233_v21, %v2188_v30  ;;  %v2201_v33 = vsub.f32 %v1709_v24, %v2188_v30  ;;  %v2207_v34 = vsub.f32 %v2185_v29, %v2188_v30 }
 0x28d   : > { %v2190_v35 = vmul.f32 1.442695, %v2189_v31  ;;  %v2196_v36 = vmul.f32 1.442695, %v2195_v32  ;;  %v2202_v37 = vmul.f32 1.442695, %v2201_v33 }
 0x28e   : > { %v2208_v38 = vmul.f32 1.442695, %v2207_v34 }
 0x28f   : > { %2760 = vpow2.f32 %v2190_v35 }
 0x290   : > { %2762 = vpow2.f32 %v2196_v36 }
 0x291   : > { %2764 = vpow2.f32 %v2202_v37 }
 0x292   : > { %2766 = vpow2.f32 %v2208_v38 }
 0x299   : > { %v2761_v39 = vpop.eup %2760 }
 0x29a   : > { %v2763_v40 = vpop.eup %2762  ;;  %v2193_v41 = vmul.f32 %v2761_v39, %v740_v59 }
 0x29b   : > { %v2765_v42 = vpop.eup %2764  ;;  %v2198_v43 = vadd.f32 %v2763_v40, %v2761_v39  ;;  %v2199_v44 = vmul.f32 %v2763_v40, %v1222_v63 }
 0x29c   : > { %v2767_v45 = vpop.eup %2766  ;;  %v2205_v48 = vmul.f32 %v2765_v42, %v1698_v3 }
 0x29d   : > { %v2204_v46 = vadd.f32 %v2765_v42, %v2198_v43  ;;  %v2200_v47 = vadd.f32 %v2199_v44, %v2193_v41  ;;  %v2211_v51 = vmul.f32 %v2767_v45, %v2174_v7 }
 0x29f   : > { %v2210_v49 = vadd.f32 %v2767_v45, %v2204_v46  ;;  %v2206_v50 = vadd.f32 %v2205_v48, %v2200_v47 }
 0x2a1   : > { %2768 = vrcp.f32 %v2210_v49  ;;  %v2212_v52 = vadd.f32 %v2211_v51, %v2206_v50 }
 0x2ab   : > { %v2769_v53 = vpop.eup %2768 }
 0x2ac   : > { %v2214_v54 = vmul.f32 %v2769_v53, %v2212_v52 }
 0x2ae   : > { %2215 = vst.msk [vmem:[%s243_s26] sm:$0xff] %vm265_vm7, %v2214_v54 }
 0x2af   : > { %2811 = shalt.err (!%p2808_p7)
}
 0x2b0   : > { %s2812_s13 = scalar_lea.hbm %s3169_s8, 128  ;;  %s2816_s16 = scalar_lea.hbm %s3217_s5, 256 }
 0x2b1   : > { %p2813_p8 = scmp.ne.s32.totalorder %s3169_s8, %s2812_s13  ;;  %p2817_p1 = scmp.lt.u32.totalorder %s3169_s8, %s3217_s5 }
 0x2b2   : > { %p2818_p0 = scmp.lt.u32.totalorder %s2816_s16, %s2812_s13  ;;  %p2820_p6 = scmp.lt.u32.totalorder %s2812_s13, %s3169_s8 }
 0x2b3   : > { %p2814_p11 = pnand %p2813_p8, %p3228_p9 }
 0x2b4   : > { %p2819_p5 = por %p2818_p0, %p2817_p1 }
 0x2b5   : > { %p2815_p13 = pneg %p2814_p11 }
 0x2b6   : > { %p2821_p10 = por %p2820_p6, %p2819_p5 }
 0x2b8   : > { %p2822_p12 = pnand %p2821_p10, %p2815_p13 }
 0x2ba   : > { %2825 = shalt.err (!%p2822_p12)
}
 0x2bb   : > { %2700 = dma.vmem_to_hbm [thread:$0]  (%p3228_p9), %s3171_s6, 128, %s3169_s8, %s2217_s9  }
 0x2bc PF: > { %p2712_p2 = scmp.ge.s32.totalorder %s2864_s21, 2  ;;  %s2242_s25 = sand.u32 1, %s2852_s18  }
 0x2bd   : > { %p3229_p3 = scmp.ne.s32.totalorder %s3222_s29, 0  ;;  %s2243_s26 = scalar_lea.sflag [#allocation4], %s2242_s25 }
 0x2bf   : > { %p2707_p4 = pnand %p2712_p2, %p3229_p3 }
 0x2c1   : > { %2847 = dma.done.wait (!%p2707_p4), %s2243_s26, 128  }
 0x2c2   : > { %2849 = vsyncadd (!%p2707_p4), %s2243_s26, 4294967168  ;;  %p16_p7 = scmp.ge.s32.totalorder %s2932_s24, 4   ;;  %s3230_s18 = smov %s2856_s19 }
 0x2c3   : > { %s3231_s19 = smov %s2860_s20  ;;  %s3232_s20 = smov %s2943_s27 }
 0x2c4   : > { %s3233_s21 = smov %s2932_s24  ;;  %18 = sbr.rel (!%p16_p7) target bundleno = 4 (0x4), region = 83 }
 0x2cb   :  { %2248 = vsyncpa [#allocation3], 1 }
 0x2cc   :  { %2250 = vsyncpa [#allocation3 + $0x1], 1 }
 0x2cd   :  { %2251 = vsyncpa [#allocation4], 1 }
 0x2ce   :  { %2253 = vsyncpa [#allocation4 + $0x1], 1 }

</bundles_post_ra>
